<compile_context>
chip_gen: v7x
topology: tpu7x:2x2x1
jax: 0.10.0
libtpu: 0.0.40
codegen_flags: <defaults>
</compile_context>

<pallas_src>
import jax
import jax.numpy as jnp
from jax.experimental import pallas as pl
from jax.experimental.pallas import tpu as pltpu


# ------------------------------- kernel --------------------------------------
def make_basic_block_kernel(H):
    """H (image height) is a static closure arg used for per-image row masks."""

    def kernel(x_ref, w1_ref, b1_ref, w2_ref, b2_ref, o_ref):
        # x_ref : (R, W*Cin)          f32 lane-dense activations (row r = one image row)
        # w1_ref: (3*W*Cin,  W*Cout)  bf16 banded conv1 weights, kh taps stacked on K
        # b1_ref: (1, W*Cout)         f32 folded BN1 bias (tiled across W)
        # w2_ref: (3*W*Cout, W*Cout)  bf16 banded conv2 weights
        # b2_ref: (1, W*Cout)         f32 folded BN2 bias
        # o_ref : (R, W*Cout)         f32 output
        f32, bf16 = jnp.float32, jnp.bfloat16
        R, WC = x_ref.shape

        # Per-image row-boundary masks, built once (VPU; iota over sublane axis).
        ridx = jax.lax.broadcasted_iota(jnp.int32, (R, WC), 0)
        not_top = (ridx % H) != 0          # a row above exists within this image
        not_bot = (ridx % H) != (H - 1)    # a row below exists within this image

        def conv3x3(v, w_ref):
            # Row shifts on the XLU (pltpu.roll, jnp.roll semantics) + VPU boundary
            # mask; the three kh taps are folded into a single K = 3*WC bf16 matmul
            # with f32 accumulation on the MXU.
            v_up = jnp.where(not_top, pltpu.roll(v, shift=1, axis=0), 0.0)       # v[r-1]
            v_dn = jnp.where(not_bot, pltpu.roll(v, shift=R - 1, axis=0), 0.0)   # v[r+1]
            v_cat = jnp.concatenate(
                [v_up.astype(bf16), v.astype(bf16), v_dn.astype(bf16)], axis=-1)
            return jnp.dot(v_cat, w_ref[...], preferred_element_type=f32)

        x = x_ref[...]                                              # (R, W*Cin) f32
        # conv1 -> BN1 (scale folded into weights, bias here) -> ReLU
        out1 = jnp.maximum(conv3x3(x, w1_ref) + b1_ref[...], 0.0)
        # conv2 -> BN2 -> + identity shortcut (x already resident) -> ReLU
        out2 = conv3x3(out1, w2_ref) + b2_ref[...] + x
        o_ref[...] = jnp.maximum(out2, 0.0)

    return kernel


# ----------------------------- wrapper helpers --------------------------------
def fold_bn(gamma, beta, mean, var, eps=1e-5):
    scale = gamma / jnp.sqrt(var + eps)
    bias = beta - mean * scale
    return scale, bias


def banded_conv_matrix(w_hwio, W):
    """Fold kw taps + width zero-padding of a 3x3 conv into per-kh banded matrices.
    Returns (3, W*Cin, W*Cout) with
      B[dh, w_in*Cin+ci, w_out*Cout+co] = w[dh, w_in-w_out+1, ci, co]
    for |w_in - w_out| <= 1 (zero elsewhere -> implicit width padding)."""
    kh, kw, cin, cout = w_hwio.shape
    w_in = jnp.arange(W)[:, None]                 # (W, 1)
    w_out = jnp.arange(W)[None, :]                # (1, W)
    dw = w_in - w_out + 1                         # tap index along kw
    valid = (dw >= 0) & (dw < kw)
    dw_c = jnp.clip(dw, 0, kw - 1)
    taps = w_hwio[:, dw_c, :, :]                  # (3, W, W, Cin, Cout)
    taps = jnp.where(valid[None, :, :, None, None], taps, 0.0)
    # (dh, w_in, w_out, ci, co) -> (dh, w_in, ci, w_out, co) -> (dh, W*Cin, W*Cout)
    return jnp.transpose(taps, (0, 1, 3, 2, 4)).reshape(kh, W * cin, W * cout)


def _choose_batching(N, H, target_rows=256):
    """Images per grid step.  Targets M ~= 256 rows (fills the 256-wide v6e/v7x
    MXU, amortizes ~0.35us/step overhead) while keeping >= 2 grid steps when
    N >= 2 so both v7x TensorCores get work.  The batch is zero-padded up to
    n_steps*nb images (padding sliced off afterwards), so prime/awkward N never
    degrades to tiny tiles."""
    nb = max(1, target_rows // H)
    while nb > 1 and -(-N // nb) < 2:
        nb = max(1, nb // 2)
    n_steps = -(-N // nb)
    return nb, n_steps


def basic_block_forward(x_nchw, params):
    """x_nchw: (N, C, H, W) float32.  Identity-shortcut BasicBlock (stride=1)."""
    w1, bn1, w2, bn2 = params["w1"], params["bn1"], params["w2"], params["bn2"]
    N, Cin, H, W = x_nchw.shape
    Cout = w1.shape[-1]
    assert Cin == Cout, "identity-shortcut configuration requires in_planes == planes"

    s1, b1 = fold_bn(*bn1)
    s2, b2 = fold_bn(*bn2)

    # Fold BN scales into the conv weights, stack kh taps along K, cast to bf16.
    B1 = banded_conv_matrix(w1.astype(jnp.float32) * s1, W).reshape(3 * W * Cin, W * Cout)
    B2 = banded_conv_matrix(w2.astype(jnp.float32) * s2, W).reshape(3 * W * Cout, W * Cout)
    B1 = B1.astype(jnp.bfloat16)
    B2 = B2.astype(jnp.bfloat16)
    b1_lane = jnp.tile(b1, W).reshape(1, W * Cout).astype(jnp.float32)
    b2_lane = jnp.tile(b2, W).reshape(1, W * Cout).astype(jnp.float32)

    # NCHW -> NHWC -> lane-dense (N*H, W*C); the reshape is contiguous (free).
    x_flat = jnp.transpose(x_nchw, (0, 2, 3, 1)).astype(jnp.float32)
    x_flat = x_flat.reshape(N * H, W * Cin)

    nb, n_steps = _choose_batching(N, H)
    n_pad = n_steps * nb
    if n_pad != N:
        # Zero-pad the batch so every grid step is full; padded rows never leak
        # into real images (per-image row masks) and are sliced off below.
        x_flat = jnp.concatenate(
            [x_flat, jnp.zeros(((n_pad - N) * H, W * Cin), jnp.float32)], axis=0)
    rows = nb * H
    assert rows % 8 == 0, "rows per grid step must be sublane-aligned"

    kernel = make_basic_block_kernel(H)

    out_flat = pl.pallas_call(
        kernel,
        out_shape=jax.ShapeDtypeStruct((n_pad * H, W * Cout), jnp.float32),
        grid_spec=pltpu.PrefetchScalarGridSpec(
            num_scalar_prefetch=0,
            grid=(n_steps,),
            in_specs=[
                pl.BlockSpec((rows, W * Cin), lambda i: (i, 0)),
                # Grid-invariant operands (weights/biases).  Tiny here; use
                # pipeline_mode=pl.Buffered(1) at real ResNet widths on v7x.
                pl.BlockSpec((3 * W * Cin, W * Cout), lambda i: (0, 0)),
                pl.BlockSpec((1, W * Cout), lambda i: (0, 0)),
                pl.BlockSpec((3 * W * Cout, W * Cout), lambda i: (0, 0)),
                pl.BlockSpec((1, W * Cout), lambda i: (0, 0)),
            ],
            out_specs=pl.BlockSpec((rows, W * Cout), lambda i: (i, 0)),
        ),
        compiler_params=pltpu.CompilerParams(
            dimension_semantics=("parallel",)),   # batch steps -> v7x megacore
    )(x_flat, B1, b1_lane, B2, b2_lane)

    # lane-dense (N*H, W*Cout) -> NHWC -> NCHW (padding dropped)
    out = out_flat[: N * H].reshape(N, H, W, Cout)
    return jnp.transpose(out, (0, 3, 1, 2))


# ----------------------------- pure-JAX reference ----------------------------
def reference_forward(x_nchw, params):
    w1, bn1, w2, bn2 = params["w1"], params["bn1"], params["w2"], params["bn2"]
    s1, b1 = fold_bn(*bn1)
    s2, b2 = fold_bn(*bn2)
    x = jnp.transpose(x_nchw, (0, 2, 3, 1))
    dn = jax.lax.conv_dimension_numbers(x.shape, w1.shape, ("NHWC", "HWIO", "NHWC"))
    hp = jax.lax.Precision.HIGHEST
    o = jax.lax.conv_general_dilated(x, w1, (1, 1), ((1, 1), (1, 1)),
                                     dimension_numbers=dn, precision=hp)
    o = jnp.maximum(o * s1 + b1, 0.0)
    o = jax.lax.conv_general_dilated(o, w2, (1, 1), ((1, 1), (1, 1)),
                                     dimension_numbers=dn, precision=hp)
    o = o * s2 + b2
    o = jnp.maximum(o + x, 0.0)
    return jnp.transpose(o, (0, 3, 1, 2))


if __name__ == "__main__":
    key = jax.random.PRNGKey(0)
    # in_planes = planes = 8, stride = 1 -> identity shortcut; W*C = 128 lanes.
    # N = 4 gives a 2-step grid (both v7x TensorCores get a block).
    N, C, H, W = 4, 8, 16, 16

    ks = jax.random.split(key, 10)
    x = jax.random.normal(ks[0], (N, C, H, W), jnp.float32)

    params = {
        "w1": 0.1 * jax.random.normal(ks[1], (3, 3, C, C), jnp.float32),
        "w2": 0.1 * jax.random.normal(ks[2], (3, 3, C, C), jnp.float32),
        # (gamma, beta, running_mean, running_var) per BN, deterministic & non-trivial
        "bn1": (1.0 + 0.1 * jax.random.normal(ks[3], (C,), jnp.float32),
                0.1 * jax.random.normal(ks[4], (C,), jnp.float32),
                0.1 * jax.random.normal(ks[5], (C,), jnp.float32),
                0.5 + jnp.abs(jax.random.normal(ks[6], (C,), jnp.float32)) * 0.5),
        "bn2": (1.0 + 0.1 * jax.random.normal(ks[7], (C,), jnp.float32),
                0.1 * jax.random.normal(ks[8], (C,), jnp.float32),
                0.1 * jax.random.normal(ks[9], (C,), jnp.float32),
                0.5 + jnp.abs(jax.random.normal(ks[6], (C,), jnp.float32)) * 0.3),
    }

    out = jax.block_until_ready(basic_block_forward(x, params))
    ref = jax.block_until_ready(reference_forward(x, params))

    assert out.shape == (N, C, H, W)
    err = jnp.max(jnp.abs(out - ref))
    # bf16 MXU operands (f32 accumulation) vs an f32-HIGHEST reference -> relaxed tol.
    assert jnp.allclose(out, ref, rtol=3e-2, atol=3e-2), f"max abs err {err}"
    print("KERNEL_OK")
</pallas_src>

<mosaic_0001>
module attributes {stable_mosaic.version = 11 : i64} {
  func.func @kernel(%arg0: i32, %arg1: memref<32x128xf32, #tpu.memory_space<vmem>>, %arg2: memref<384x128xbf16, #tpu.memory_space<vmem>>, %arg3: memref<1x128xf32, #tpu.memory_space<vmem>>, %arg4: memref<384x128xbf16, #tpu.memory_space<vmem>>, %arg5: memref<1x128xf32, #tpu.memory_space<vmem>>, %arg6: memref<32x128xf32, #tpu.memory_space<vmem>>) attributes {dimension_semantics = [#tpu.dimension_semantics<parallel>], iteration_bounds = array<i64: 2>, scalar_prefetch = 0 : i64, scratch_operands = 0 : i64, tpu.core_type = #tpu.core_type<tc>, window_params = [{transform_indices = @transform_0, window_bounds = array<i64: 32, 128>}, {pipeline_mode = #tpu.pipeline_mode<synchronous>, transform_indices = @transform_1, window_bounds = array<i64: 384, 128>}, {pipeline_mode = #tpu.pipeline_mode<synchronous>, transform_indices = @transform_2, window_bounds = array<i64: 1, 128>}, {pipeline_mode = #tpu.pipeline_mode<synchronous>, transform_indices = @transform_3, window_bounds = array<i64: 384, 128>}, {pipeline_mode = #tpu.pipeline_mode<synchronous>, transform_indices = @transform_4, window_bounds = array<i64: 1, 128>}, {transform_indices = @transform_5, window_bounds = array<i64: 32, 128>}]} {
    %0 = tpu.iota {dimensions = array<i32: 0>} : vector<32x128xi32>
    %c16_i32 = arith.constant 16 : i32
    %c0_i32 = arith.constant 0 : i32
    %1 = arith.cmpi eq, %c16_i32, %c0_i32 : i32
    %c1_i32 = arith.constant 1 : i32
    %2 = arith.select %1, %c1_i32, %c16_i32 : i32
    %3 = vector.broadcast %2 : i32 to vector<32x128xi32>
    %4 = arith.remsi %0, %3 : vector<32x128xi32>
    %c0_i32_0 = arith.constant 0 : i32
    %5 = vector.broadcast %c0_i32_0 : i32 to vector<32x128xi32>
    %6 = arith.cmpi ne, %4, %5 : vector<32x128xi32>
    %c0_i32_1 = arith.constant 0 : i32
    %7 = vector.broadcast %c0_i32_1 : i32 to vector<32x128xi32>
    %8 = arith.cmpi slt, %4, %7 : vector<32x128xi32>
    %c0_i32_2 = arith.constant 0 : i32
    %9 = arith.cmpi slt, %2, %c0_i32_2 : i32
    %10 = vector.broadcast %9 : i1 to vector<32x128xi1>
    %11 = vector.broadcast %10 : vector<32x128xi1> to vector<32x128xi1>
    %12 = arith.xori %8, %11 : vector<32x128xi1>
    %13 = arith.andi %12, %6 : vector<32x128xi1>
    %14 = vector.broadcast %2 : i32 to vector<32x128xi32>
    %15 = arith.addi %4, %14 : vector<32x128xi32>
    %16 = arith.select %13, %15, %4 : vector<32x128xi1>, vector<32x128xi32>
    %c0_i32_3 = arith.constant 0 : i32
    %17 = vector.broadcast %c0_i32_3 : i32 to vector<32x128xi32>
    %18 = arith.cmpi ne, %16, %17 : vector<32x128xi32>
    %c16_i32_4 = arith.constant 16 : i32
    %c0_i32_5 = arith.constant 0 : i32
    %19 = arith.cmpi eq, %c16_i32_4, %c0_i32_5 : i32
    %c1_i32_6 = arith.constant 1 : i32
    %20 = arith.select %19, %c1_i32_6, %c16_i32_4 : i32
    %21 = vector.broadcast %20 : i32 to vector<32x128xi32>
    %22 = arith.remsi %0, %21 : vector<32x128xi32>
    %c0_i32_7 = arith.constant 0 : i32
    %23 = vector.broadcast %c0_i32_7 : i32 to vector<32x128xi32>
    %24 = arith.cmpi ne, %22, %23 : vector<32x128xi32>
    %c0_i32_8 = arith.constant 0 : i32
    %25 = vector.broadcast %c0_i32_8 : i32 to vector<32x128xi32>
    %26 = arith.cmpi slt, %22, %25 : vector<32x128xi32>
    %c0_i32_9 = arith.constant 0 : i32
    %27 = arith.cmpi slt, %20, %c0_i32_9 : i32
    %28 = vector.broadcast %27 : i1 to vector<32x128xi1>
    %29 = vector.broadcast %28 : vector<32x128xi1> to vector<32x128xi1>
    %30 = arith.xori %26, %29 : vector<32x128xi1>
    %31 = arith.andi %30, %24 : vector<32x128xi1>
    %32 = vector.broadcast %20 : i32 to vector<32x128xi32>
    %33 = arith.addi %22, %32 : vector<32x128xi32>
    %34 = arith.select %31, %33, %22 : vector<32x128xi1>, vector<32x128xi32>
    %c15_i32 = arith.constant 15 : i32
    %35 = vector.broadcast %c15_i32 : i32 to vector<32x128xi32>
    %36 = arith.cmpi ne, %34, %35 : vector<32x128xi32>
    %c0 = arith.constant 0 : index
    %c0_10 = arith.constant 0 : index
    %37 = vector.load %arg1[%c0, %c0_10] : memref<32x128xf32, #tpu.memory_space<vmem>>, vector<32x128xf32>
    %c1_i32_11 = arith.constant 1 : i32
    %38 = tpu.dynamic_rotate %37 by %c1_i32_11 dim 0 : vector<32x128xf32>, i32 -> vector<32x128xf32>
    %cst = arith.constant 0.000000e+00 : f32
    %39 = vector.broadcast %cst : f32 to vector<32x128xf32>
    %40 = arith.select %18, %38, %39 : vector<32x128xi1>, vector<32x128xf32>
    %c31_i32 = arith.constant 31 : i32
    %41 = tpu.dynamic_rotate %37 by %c31_i32 dim 0 : vector<32x128xf32>, i32 -> vector<32x128xf32>
    %cst_12 = arith.constant 0.000000e+00 : f32
    %42 = vector.broadcast %cst_12 : f32 to vector<32x128xf32>
    %43 = arith.select %36, %41, %42 : vector<32x128xi1>, vector<32x128xf32>
    %44 = arith.truncf %40 : vector<32x128xf32> to vector<32x128xbf16>
    %45 = arith.truncf %37 : vector<32x128xf32> to vector<32x128xbf16>
    %46 = arith.truncf %43 : vector<32x128xf32> to vector<32x128xbf16>
    %47 = tpu.concatenate %44, %45, %46 in 1 : vector<32x128xbf16>, vector<32x128xbf16>, vector<32x128xbf16> -> vector<32x384xbf16>
    %c0_13 = arith.constant 0 : index
    %c0_14 = arith.constant 0 : index
    %48 = vector.load %arg2[%c0_13, %c0_14] : memref<384x128xbf16, #tpu.memory_space<vmem>>, vector<384x128xbf16>
    %cst_15 = arith.constant dense<0.000000e+00> : vector<32x128xf32>
    %49 = tpu.matmul %47, %48, %cst_15 {dimension_numbers = #tpu.dot_dimension_numbers<[1], [0], [0], [1], [0, 0, 1, 1], [], []>} : vector<32x384xbf16>, vector<384x128xbf16>, vector<32x128xf32> -> vector<32x128xf32>
    %c0_16 = arith.constant 0 : index
    %c0_17 = arith.constant 0 : index
    %50 = vector.load %arg3[%c0_16, %c0_17] : memref<1x128xf32, #tpu.memory_space<vmem>>, vector<1x128xf32>
    %51 = vector.broadcast %50 : vector<1x128xf32> to vector<32x128xf32>
    %52 = arith.addf %49, %51 : vector<32x128xf32>
    %cst_18 = arith.constant 0.000000e+00 : f32
    %53 = vector.broadcast %cst_18 : f32 to vector<32x128xf32>
    %54 = arith.maximumf %52, %53 : vector<32x128xf32>
    %c1_i32_19 = arith.constant 1 : i32
    %55 = tpu.dynamic_rotate %54 by %c1_i32_19 dim 0 : vector<32x128xf32>, i32 -> vector<32x128xf32>
    %cst_20 = arith.constant 0.000000e+00 : f32
    %56 = vector.broadcast %cst_20 : f32 to vector<32x128xf32>
    %57 = arith.select %18, %55, %56 : vector<32x128xi1>, vector<32x128xf32>
    %c31_i32_21 = arith.constant 31 : i32
    %58 = tpu.dynamic_rotate %54 by %c31_i32_21 dim 0 : vector<32x128xf32>, i32 -> vector<32x128xf32>
    %cst_22 = arith.constant 0.000000e+00 : f32
    %59 = vector.broadcast %cst_22 : f32 to vector<32x128xf32>
    %60 = arith.select %36, %58, %59 : vector<32x128xi1>, vector<32x128xf32>
    %61 = arith.truncf %57 : vector<32x128xf32> to vector<32x128xbf16>
    %62 = arith.truncf %54 : vector<32x128xf32> to vector<32x128xbf16>
    %63 = arith.truncf %60 : vector<32x128xf32> to vector<32x128xbf16>
    %64 = tpu.concatenate %61, %62, %63 in 1 : vector<32x128xbf16>, vector<32x128xbf16>, vector<32x128xbf16> -> vector<32x384xbf16>
    %c0_23 = arith.constant 0 : index
    %c0_24 = arith.constant 0 : index
    %65 = vector.load %arg4[%c0_23, %c0_24] : memref<384x128xbf16, #tpu.memory_space<vmem>>, vector<384x128xbf16>
    %cst_25 = arith.constant dense<0.000000e+00> : vector<32x128xf32>
    %66 = tpu.matmul %64, %65, %cst_25 {dimension_numbers = #tpu.dot_dimension_numbers<[1], [0], [0], [1], [0, 0, 1, 1], [], []>} : vector<32x384xbf16>, vector<384x128xbf16>, vector<32x128xf32> -> vector<32x128xf32>
    %c0_26 = arith.constant 0 : index
    %c0_27 = arith.constant 0 : index
    %67 = vector.load %arg5[%c0_26, %c0_27] : memref<1x128xf32, #tpu.memory_space<vmem>>, vector<1x128xf32>
    %68 = vector.broadcast %67 : vector<1x128xf32> to vector<32x128xf32>
    %69 = arith.addf %66, %68 : vector<32x128xf32>
    %70 = arith.addf %69, %37 : vector<32x128xf32>
    %cst_28 = arith.constant 0.000000e+00 : f32
    %71 = vector.broadcast %cst_28 : f32 to vector<32x128xf32>
    %72 = arith.maximumf %70, %71 : vector<32x128xf32>
    %c0_29 = arith.constant 0 : index
    %c0_30 = arith.constant 0 : index
    %73 = vector.load %arg6[%c0_29, %c0_30] : memref<32x128xf32, #tpu.memory_space<vmem>>, vector<32x128xf32>
    tpu.vector_store %arg6[%c0_29, %c0_30], %72 {strides = array<i32>} : memref<32x128xf32, #tpu.memory_space<vmem>>, vector<32x128xf32>,
    return
  }
  func.func @transform_0(%arg0: i32) -> (i32, i32) {
    %c0_i32 = arith.constant 0 : i32
    %c0_i32_0 = arith.constant 0 : i32
    return %arg0, %c0_i32 : i32, i32
  }
  func.func @transform_1(%arg0: i32) -> (i32, i32) {
    %c0_i32 = arith.constant 0 : i32
    %c0_i32_0 = arith.constant 0 : i32
    %c0_i32_1 = arith.constant 0 : i32
    return %c0_i32, %c0_i32_0 : i32, i32
  }
  func.func @transform_2(%arg0: i32) -> (i32, i32) {
    %c0_i32 = arith.constant 0 : i32
    %c0_i32_0 = arith.constant 0 : i32
    %c0_i32_1 = arith.constant 0 : i32
    return %c0_i32, %c0_i32_0 : i32, i32
  }
  func.func @transform_3(%arg0: i32) -> (i32, i32) {
    %c0_i32 = arith.constant 0 : i32
    %c0_i32_0 = arith.constant 0 : i32
    %c0_i32_1 = arith.constant 0 : i32
    return %c0_i32, %c0_i32_0 : i32, i32
  }
  func.func @transform_4(%arg0: i32) -> (i32, i32) {
    %c0_i32 = arith.constant 0 : i32
    %c0_i32_0 = arith.constant 0 : i32
    %c0_i32_1 = arith.constant 0 : i32
    return %c0_i32, %c0_i32_0 : i32, i32
  }
  func.func @transform_5(%arg0: i32) -> (i32, i32) {
    %c0_i32 = arith.constant 0 : i32
    %c0_i32_0 = arith.constant 0 : i32
    return %arg0, %c0_i32 : i32, i32
  }
}

</mosaic_0001>

<bundles_post_ra>
// kernel: tpu_custom_call.1
= control target key start
LH: loop header
LB: loop body
LE: loop exit
PB: predicated region body
PF: predicated region fallthrough
CT: control target
= control target key end

     0   :  { %10 = vsyncpa [#allocation3], 0  ;;  %s2017_s0 = inlined_call_operand.hbm [shape: f32[64,128], index: 0, kind: input, shape index: {}]   ;;  %s2018_s1 = inlined_call_operand.hbm [shape: bf16[384,128], index: 1, kind: input, shape index: {}]   ;;  %s2019_s2 = inlined_call_operand.vmem [shape: f32[1,128], index: 2, kind: input, shape index: {}]   ;;  %s2020_s3 = inlined_call_operand.hbm [shape: bf16[384,128], index: 3, kind: input, shape index: {}]   ;;  %s2021_s4 = inlined_call_operand.vmem [shape: f32[1,128], index: 4, kind: input, shape index: {}]   ;;  %s2022_s5 = inlined_call_operand.hbm [shape: f32[64,128], index: 5, kind: output, shape index: {}]  }
   0x1   :  { %12 = vsyncpa [#allocation3 + $0x1], 0 }
   0x2   :  { %13 = vsyncpa [#allocation6], 0 }
   0x3   :  { %14 = vsyncpa [#allocation4], 0 }
   0x4   :  { %16 = vsyncpa [#allocation4 + $0x1], 0  ;;  %s1649_s18 = smov 0   ;;  %s1651_s19 = smov 0  }
   0x5   :  { %s1653_s20 = smov 0   ;;  %s1655_s21 = smov 0  }
   0x6 LB: > { %s1670_s22 = sadd.s32 4294967295, %s1606_s21   ;;  %s1118_s23 = sadd.s32 4294967294, %s1606_s21   ;;  %s1606_s21 = sphi %s1655_s21, %s2056_s21   ;;  %s1602_s20 = sphi %s1653_s20, %s2055_s20   ;;  %s1598_s19 = sphi %s1651_s19, %s2054_s19   ;;  %s1594_s18 = sphi %s1649_s18, %s2053_s18  }
   0x7   : > { %p42_p0 = scmp.ne.s32.totalorder %s1598_s19, %s1594_s18  ;;  %p2023_p1 = scmp.eq.s32.totalorder %s1670_s22, 0 }
   0x8   : > { %p156_p3 = scmp.eq.s32.totalorder %s1118_s23, 1  ;;  %p1119_p5 = scmp.ge.s32.totalorder %s1606_s21, 1 }
   0x9   : > { %p1679_p4 = por %p2023_p1, %p42_p0  ;;  %p163_p7 = scmp.lt.s32.totalorder %s1606_s21, 3 }
   0xa   : > { %p1684_p6 = por %p156_p3, %p42_p0  ;;  %s1608_s27 = smov [#allocation5]  }
   0xb   : > { %s2026_s24 = scalar_select %p1679_p4, 1, 0 }
   0xc   : > { %s2027_s25 = scalar_select %p1684_p6, 1, 0 }
   0xd   : > { %p1689_p8 = pnand %p1119_p5, %p163_p7  ;;  %s175_s28 = sshll.u32 %s1608_s27, 4  ;;  %s1693_s28 = int_to_ptr.vmem [resolvable:$true] %s175_s28 }
   0xe   : > { %s1609_s30 = smov [#allocation7]   ;;  %s1450_s9 = scalar_lea.hbm %s2018_s1, 3072 }
   0xf   : > { %p1340_p9 = pneg %p1689_p8  ;;  %s191_s6 = sshll.u32 %s1609_s30, 4  ;;  %s1704_s6 = int_to_ptr.vmem [resolvable:$true] %s191_s6 }
  0x10   : > { %p1451_p12 = scmp.ne.s32.totalorder %s2018_s1, %s1450_s9  ;;  %p1457_p5 = scmp.lt.u32.totalorder %s1450_s9, %s2018_s1 }
  0x11   : > { %p1700_p11 = pnand %p1340_p9, %p2023_p1 }
  0x13   : > { %p1452_p13 = pneg %p1700_p11 }
  0x15   : > { %p1453_p0 = pnand %p1452_p13, %p1451_p12 }
  0x17   : > { %p1454_p3 = pneg %p1453_p0 }
  0x19   : > { %p1459_p7 = pnand %p1457_p5, %p1454_p3 }
  0x1b   : > { %1462 = shalt.err (!%p1459_p7)
}
  0x1c   : > { %s1463_s14 = scalar_lea.vmem %s1693_s28, 3072  ;;  %p1471_p2 = scmp.lt.s32.totalorder %s1693_s28, %s1693_s28 }
  0x1d   : > { %p1464_p9 = scmp.ne.s32.totalorder %s1693_s28, %s1463_s14  ;;  %p1472_p12 = scmp.lt.s32.totalorder %s1463_s14, %s1463_s14 }
  0x1f   : > { %p1466_p10 = pnand %p1464_p9, %p1452_p13  ;;  %p1473_p0 = por %p1472_p12, %p1471_p2 }
  0x21   : > { %p1467_p1 = pneg %p1466_p10 }
  0x23   : > { %p1474_p6 = pnand %p1473_p0, %p1467_p1 }
  0x25   : > { %1477 = shalt.err (!%p1474_p6)
}
  0x26   : > { %s1610_s15 = smov 64   ;;  %s1611_s16 = smov 4  }
  0x27   : > { %1343 = dma.hbm_to_vmem [thread:$0]  (!%p1700_p11), %s2018_s1, 3072, %s1693_s28, [#allocation6], %s1610_s15, %s1610_s15, %s1611_s16  }
  0x28   : > { %s1478_s7 = scalar_lea.hbm %s2020_s3, 3072 }
  0x29   : > { %p1479_p2 = scmp.ne.s32.totalorder %s2020_s3, %s1478_s7  ;;  %p1485_p10 = scmp.lt.u32.totalorder %s1478_s7, %s2020_s3 }
  0x2b   : > { %p1481_p1 = pnand %p1479_p2, %p1452_p13 }
  0x2d   : > { %p1482_p6 = pneg %p1481_p1 }
  0x2f   : > { %p1487_p3 = pnand %p1485_p10, %p1482_p6 }
  0x31   : > { %1490 = shalt.err (!%p1487_p3)
}
  0x32   : > { %s1491_s28 = scalar_lea.vmem %s1704_s6, 3072  ;;  %p1499_p12 = scmp.lt.s32.totalorder %s1704_s6, %s1704_s6 }
  0x33   : > { %p1492_p5 = scmp.ne.s32.totalorder %s1704_s6, %s1491_s28  ;;  %p1500_p0 = scmp.lt.s32.totalorder %s1491_s28, %s1491_s28 }
  0x35   : > { %p1494_p7 = pnand %p1492_p5, %p1452_p13  ;;  %p1501_p2 = por %p1500_p0, %p1499_p12 }
  0x37   : > { %p1495_p9 = pneg %p1494_p7 }
  0x39   : > { %p1502_p1 = pnand %p1501_p2, %p1495_p9 }
  0x3b   : > { %1505 = shalt.err (!%p1502_p1)
}
  0x3c   : > { %1346 = dma.hbm_to_vmem [thread:$0]  (!%p1700_p11), %s2020_s3, 3072, %s1704_s6, [#allocation6], %s1610_s15, %s1610_s15, %s1611_s16  }
  0x3d   : > { %s1759_s14 = sadd.s32 1, %s1606_s21   ;;  %s29_s29 = sadd.s32 1, %s1602_s20 }
  0x3e   : > { %s26_s17 = ssub.s32 %s1606_s21, %s1759_s14  ;;  %p36_p13 = scmp.ne.s32.totalorder %s1602_s20, %s1598_s19 }
  0x3f   : > { %p27_p6 = scmp.eq.s32.totalorder %s26_s17, 0  ;;  %p37_p10 = scmp.eq.s32.totalorder %s1606_s21, 0 }
  0x40   : > { %p2030_p3 = scmp.eq.s32.totalorder %s1670_s22, 1  ;;  %p1357_p7 = scmp.lt.s32.totalorder %s1606_s21, 2 }
  0x41   : > { %s1775_s27 = scalar_select %p27_p6, %s1602_s20, %s29_s29  }
  0x42   : > { %p1769_p5 = por %p2030_p3, %p36_p13  ;;  %p38_p9 = por %p37_p10, %p36_p13 }
  0x43   : > { %s208_s30 = sand.u32 1, %s1602_s20   ;;  %s1210_s6 = sshll.u32 %s1606_s21, 9 }
  0x44   : > { %s2031_s23 = scalar_select %p1769_p5, 1, 0 }
  0x45   : > { %s1123_s7 = sshll.u32 %s208_s30, 5  ;;  %s1782_s8 = scalar_lea.hbm %s2017_s0, %s1210_s6 }
  0x46   : > { %s212_s9 = scalar_lea.vmem [#allocation2], %s1123_s7  ;;  %p1786_p11 = pnand %p1357_p7, %p38_p9 }
  0x47   : > { %s219_s10 = sshll.u32 %s212_s9, 4  ;;  %s1790_s28 = scalar_lea.sflag [#allocation3], %s208_s30  ;;  %s1784_s10 = int_to_ptr.vmem [resolvable:$true] %s219_s10 }
  0x48   : > { %s1506_s12 = scalar_lea.hbm %s1782_s8, 512  ;;  %p1508_p0 = pneg %p1786_p11 }
  0x49   : > { %p1507_p12 = scmp.ne.s32.totalorder %s1782_s8, %s1506_s12  ;;  %s1511_s17 = scalar_lea.hbm %s2017_s0, 1024 }
  0x4a   : > { %p1512_p13 = scmp.lt.u32.totalorder %s1782_s8, %s2017_s0  ;;  %p1513_p6 = scmp.lt.u32.totalorder %s1511_s17, %s1506_s12 }
  0x4b   : > { %p1509_p2 = pnand %p1508_p0, %p1507_p12  ;;  %p1515_p3 = scmp.lt.u32.totalorder %s1506_s12, %s1782_s8 }
  0x4c   : > { %p1514_p10 = por %p1513_p6, %p1512_p13 }
  0x4d   : > { %p1510_p1 = pneg %p1509_p2 }
  0x4e   : > { %p1516_p7 = por %p1515_p3, %p1514_p10 }
  0x50   : > { %p1517_p9 = pnand %p1516_p7, %p1510_p1 }
  0x52   : > { %1520 = shalt.err (!%p1517_p9)
}
  0x53   : > { %s1521_s30 = scalar_lea.vmem %s1784_s10, 512  ;;  %s1612_s15 = smov [#allocation2]  }
  0x54   : > { %p1522_p12 = scmp.ne.s32.totalorder %s1784_s10, %s1521_s30  ;;  %s1526_s16 = sshll.u32 %s1612_s15, 4  ;;  %s1527_s16 = int_to_ptr.vmem [resolvable:$false] %s1526_s16 }
  0x55   : > { %s1528_s9 = scalar_lea.vmem %s1527_s16, 1024  ;;  %p1529_p4 = scmp.lt.s32.totalorder %s1784_s10, %s1527_s16 }
  0x56   : > { %p1524_p2 = pnand %p1522_p12, %p1508_p0  ;;  %p1530_p13 = scmp.lt.s32.totalorder %s1528_s9, %s1521_s30 }
  0x58   : > { %p1525_p5 = pneg %p1524_p2  ;;  %p1531_p6 = por %p1530_p13, %p1529_p4 }
  0x5a   : > { %p1532_p10 = pnand %p1531_p6, %p1525_p5 }
  0x5c   : > { %1535 = shalt.err (!%p1532_p10)
}
  0x5d   : > { %s1613_s12 = smov 128   ;;  %s1614_s13 = smov 8  }
  0x5e   : > { %1350 = dma.hbm_to_vmem [thread:$0]  (!%p1786_p11), %s1782_s8, 512, %s1784_s10, %s1790_s28, %s1613_s12, %s1613_s12, %s1614_s13  }
  0x5f   : > { %231 = sbr.rel (%p1689_p8) target bundleno = 623 (0x26f), region = 40  ;;  %s1821_s29 = sand.u32 (!%p1689_p8), 1, %s1598_s19  }
  0x60   : > { %s1127_s17 = sshll.u32 (!%p1689_p8), %s1821_s29, 5  ;;  %s234_s7 = scalar_lea.sflag (!%p1689_p8), [#allocation3], %s1821_s29 }
  0x61   : > { %s1827_s6 = scalar_lea.vmem (!%p1689_p8), [#allocation2], %s1127_s17  ;;  %p2033_p4 = scmp.ne.s32.totalorder (!%p1689_p8), %s2026_s24, 0 }
  0x66   : > { %1581 = dma.done.wait (%p2033_p4), %s234_s7, 512  }
  0x67   : > { %1583 = vsyncadd (%p2033_p4), %s234_s7, 4294966784  ;;  %p2034_p5 = scmp.eq.s32.totalorder %s1670_s22, 0 }
  0x69   : > { %1585 = dma.done.wait (%p2034_p5), [#allocation6], 6144   ;;  %p2035_p8 = pmov %p2034_p5 }
  0x6a   : > { %v1402_v0 = vld [vmem:[#allocation5 + $0x40] sm:$0xff]   ;;  %v1404_v2 = vld [vmem:[#allocation5 + $0x48] sm:$0xff]   ;;  %v1407_v5 = vld [vmem:[#allocation5 + $0x50] sm:$0xff]   ;;  %v275_v7 = vlaneseq  ;;  %vm1615_vm5 = vmmov 1   ;;  %s271_s11 = scalar_lea.vmem [#allocation8], %s1127_s17  ;;  %s1211_s30 = sshll.u32 %s1670_s22, 9 }
  0x6b   : > { %1587 = vsyncadd (%p2035_p8), [#allocation6], 4294961152  ;;  %v1403_v1 = vld [vmem:[#allocation5] sm:$0xff]   ;;  %1212 = vmatprep.subr.bf16.mxu0 %v1402_v0  ;;  %v1406_v4 = vld [vmem:[#allocation5 + $0x8] sm:$0xff]   ;;  %s1026_s28 = sshll.u32 %s271_s11, 4  ;;  %s1973_s9 = scalar_lea.hbm %s2022_s5, %s1211_s30  ;;  %s1967_s28 = int_to_ptr.vmem [resolvable:$true] %s1026_s28 }
  0x6c   : > { %1213 = vmatpush3.bf16.msra.mxu0 %v1403_v1  ;;  %v1405_v3 = vld [vmem:[#allocation5 + $0x80] sm:$0xff]   ;;  %v1408_v6 = vld [vmem:[#allocation5 + $0x88] sm:$0xff]   ;;  %v1409_v8 = vld [vmem:[#allocation5 + $0x10] sm:$0xff]   ;;  %v1837_v12 = vshrl.u32 %v275_v7, 7  ;;  %s1013_s12 = scalar_lea.sflag [#allocation4], %s1821_s29  ;;  %s1536_s13 = scalar_lea.vmem %s1967_s28, 512 }
  0x6d   : > { %1214 = vmatprep.subr.bf16.mxu0 %v1404_v2  ;;  %1288 = vmatprep.subr.bf16.mxu1 %v1405_v3  ;;  %v1410_v9 = vld [vmem:[#allocation5 + $0x58] sm:$0xff]   ;;  %v1411_v10 = vld [vmem:[#allocation5 + $0x90] sm:$0xff]   ;;  %v1413_v13 = vld [vmem:[#allocation5 + $0x60] sm:$0xff]   ;;  %p1537_p11 = scmp.ne.s32.totalorder %s1967_s28, %s1536_s13  ;;  %p2050_p0 = scmp.ne.s32.totalorder %s2031_s23, 0 }
  0x6e   : > { %1289 = vmatpush3.bf16.msra.mxu1 %v1405_v3  ;;  %v1412_v11 = vld [vmem:[#allocation5 + $0x18] sm:$0xff]   ;;  %v1415_v15 = vld [vmem:[#allocation5 + $0x20] sm:$0xff]   ;;  %v277_v16 = vadd.s32 8, %v1837_v12  ;;  %v279_v18 = vadd.s32 24, %v1837_v12  ;;  %v1416_v19 = vld [vmem:[#allocation5 + $0x68] sm:$0xff]   ;;  %v284_v20 = vand.u32 15, %v1837_v12 }
  0x6f   : > { %1290 = vmatprep.subr.bf16.mxu1 %v1408_v6  ;;  %v1414_v14 = vld [vmem:[#allocation5 + $0x98] sm:$0xff]   ;;  %v1417_v17 = vld [vmem:[#allocation5 + $0xa0] sm:$0xff]   ;;  %v278_v21 = vadd.s32 16, %v1837_v12  ;;  %v1418_v22 = vld [vmem:[#allocation5 + $0x28] sm:$0xff]   ;;  %vm344_vm0 = vcmp.lt.s32.totalorder %v1837_v12, 1  ;;  %vm357_vm1 = vcmp.lt.s32.totalorder %v1837_v12, 7  ;;  %p1538_p1 = pnand %p1537_p11, %p2050_p0 }
  0x70   : > { %1215 = vmatpush3.bf16.msra.mxu0 %v1406_v4  ;;  %v291_v23 = vand.u32 15, %v277_v16  ;;  %v1420_v24 = vld [vmem:[#allocation5 + $0xa8] sm:$0xff]   ;;  %v305_v25 = vand.u32 15, %v279_v18  ;;  %v1419_v26 = vld [vmem:[#allocation5 + $0x70] sm:$0xff]   ;;  %vm1845_vm2 = vcmp.ne.s32.totalorder %v284_v20, 0  ;;  %v1850_v30 = vld [vmem:[%s1827_s6] sm:$0xff] }
  0x71   : > { %1216 = vmatprep.subr.bf16.mxu0 %v1407_v5  ;;  %v1421_v27 = vld [vmem:[#allocation5 + $0x30] sm:$0xff]   ;;  %v1853_v31 = vld [vmem:[%s1827_s6 + $0x8] sm:$0xff]  ;;  %v1856_v32 = vld [vmem:[%s1827_s6 + $0x18] sm:$0xff]  ;;  %v298_v35 = vand.u32 15, %v278_v21  ;;  %v340_v37 = vrot.slane %v1850_v30, 7  ;;  %v353_v43 = vrot.slane %v1850_v30, 1  ;;  %p1539_p3 = pneg %p1538_p1 }
  0x72   : > { %1291 = vmatpush3.bf16.msra.mxu1 %v1408_v6  ;;  %v1423_v28 = vld [vmem:[#allocation5 + $0xb0] sm:$0xff]   ;;  %vm1858_vm3 = vcmp.ne.s32.totalorder %v291_v23, 15  ;;  %vm1862_vm4 = vcmp.ne.s32.totalorder %v305_v25, 15  ;;  %v1422_v36 = vld [vmem:[#allocation5 + $0x78] sm:$0xff]   ;;  %v341_v38 = vrot.slane %v1853_v31, 7  ;;  %v368_v39 = vpack.c.bf16 %v1853_v31, %v1850_v30  ;;  %vm1879_vm6 = vmpackc.low %vm1615_vm5, %vm1845_vm2  ;;  %s1616_s22 = smov [#allocation8]  }
  0x73   : > { %1292 = vmatprep.subr.bf16.mxu1 %v1411_v10  ;;  %v343_v40 = vrot.slane %v1856_v32, 7  ;;  %v1424_v41 = vld [vmem:[#allocation5 + $0x38] sm:$0xff]   ;;  %v1872_v42 = vld [vmem:[%s1827_s6 + $0x10] sm:$0xff]  ;;  %v354_v44 = vrot.slane %v1853_v31, 1  ;;  %v356_v47 = vrot.slane %v1856_v32, 1  ;;  %vm1894_vm7 = vmpackc.low %vm1858_vm3, %vm1615_vm5  ;;  %vm330_vm8 = vcmp.ne.s32.totalorder %v298_v35, 0 }
  0x74   : > { %1217 = vmatpush3.bf16.msra.mxu0 %v1409_v8  ;;  %603 = vmatprep.mubr.bf16.mxu0 %v368_v39  ;;  %v355_v46 = vrot.slane %v1872_v42, 1  ;;  %v347_v48 = vsel %vm344_vm0, %v340_v37, %v341_v38  ;;  %v1425_v50 = vld [vmem:[#allocation5 + $0xb8] sm:$0xff]   ;;  %v1426_v54 = vld [vmem:[#allocation7 + $0x40] sm:$0xff]   ;;  %vm1903_vm9 = vmpackc.low %vm1862_vm4, %vm1615_vm5  ;;  %v369_v61 = vpack.c.bf16 %v1856_v32, %v1872_v42  ;;  %v342_v62 = vrot.slane %v1872_v42, 7  ;;  %s1540_s17 = sshll.u32 %s1616_s22, 4  ;;  %s1541_s17 = int_to_ptr.vmem [resolvable:$false] %s1540_s17 }
  0x75   : > { %1218 = vmatprep.subr.bf16.mxu0 %v1410_v9  ;;  %v348_v49 = vsel %vm344_vm0, %v343_v40, %v340_v37  ;;  %v360_v51 = vsel %vm357_vm1, %v353_v43, %v354_v44  ;;  %v361_v59 = vsel %vm357_vm1, %v356_v47, %v353_v43  ;;  %v1427_v60 = vld [vmem:[#allocation7 + $0x80] sm:$0xff]   ;;  %vm1915_vm10 = vmpackc.low %vm1615_vm5, %vm330_vm8  ;;  %v1429_v1 = vld [vmem:[#allocation7 + $0x48] sm:$0xff]   ;;  %s1542_s7 = scalar_lea.vmem %s1541_s17, 1024  ;;  %p1543_p7 = scmp.lt.s32.totalorder %s1967_s28, %s1541_s17 }
  0x76   : > { %1293 = vmatpush3.bf16.msra.mxu1 %v1411_v10  ;;  %v359_v53 = vsel %vm357_vm1, %v354_v44, %v355_v46  ;;  %v1157_v57 = vpack.c.bf16 %v347_v48, %v348_v49  ;;  %v358_v58 = vsel %vm357_vm1, %v355_v46, %v356_v47  ;;  %v1428_v0 = vld [vmem:[#allocation7] sm:$0xff]   ;;  %v1430_v3 = vld [vmem:[#allocation7 + $0x88] sm:$0xff]   ;;  %v345_v5 = vsel %vm344_vm0, %v342_v62, %v343_v40  ;;  %v1432_v8 = vld [vmem:[#allocation7 + $0x50] sm:$0xff]   ;;  %p1544_p9 = scmp.lt.s32.totalorder %s1542_s7, %s1536_s13 }
  0x77   : > { %1294 = vmatprep.subr.bf16.mxu1 %v1414_v14  ;;  %v1163_v55 = vpack.c.bf16 %v359_v53, %v360_v51  ;;  %v1166_v2 = vpack.c.bf16 %v361_v59, %v358_v58  ;;  %v1431_v4 = vld [vmem:[#allocation7 + $0x8] sm:$0xff]   ;;  %v346_v6 = vsel %vm344_vm0, %v341_v38, %v342_v62  ;;  %v1433_v9 = vld [vmem:[#allocation7 + $0x90] sm:$0xff]   ;;  %v1439_v16 = vld [vmem:[#allocation7 + $0xa0] sm:$0xff]  }
  0x78   : > { %1219 = vmatpush3.bf16.msra.mxu0 %v1412_v11  ;;  %v1160_v7 = vpack.c.bf16 %v345_v5, %v346_v6  ;;  %v1434_v10 = vld [vmem:[#allocation7 + $0x10] sm:$0xff]   ;;  %v1435_v11 = vld [vmem:[#allocation7 + $0x58] sm:$0xff]   ;;  %v1441_v18 = vld [vmem:[#allocation7 + $0x68] sm:$0xff]   ;;  %p1545_p12 = por %p1544_p9, %p1543_p7 }
  0x79   : > { %1220 = vmatprep.subr.bf16.mxu0 %v1413_v13  ;;  %1304 = vmatprep.mubr.msk.bf16.mxu1 %vm1894_vm7, %v1163_v55  ;;  %v1436_v13 = vld [vmem:[#allocation7 + $0x98] sm:$0xff]   ;;  %v1443_v20 = vld [vmem:[#allocation7 + $0x28] sm:$0xff]   ;;  %v1444_v21 = vld [vmem:[#allocation7 + $0x70] sm:$0xff]  }
  0x7a   : > { %1295 = vmatpush3.bf16.msra.mxu1 %v1414_v14  ;;  %v1437_v14 = vld [vmem:[#allocation7 + $0x18] sm:$0xff]   ;;  %v1446_v23 = vld [vmem:[#allocation7 + $0x30] sm:$0xff]   ;;  %v1131_v29 = vld [vmem:[%s2019_s2] ss:$0 sm:$0xff]  ;;  %p1546_p2 = pnand %p1545_p12, %p1539_p3 }
  0x7b   : > { %1296 = vmatprep.subr.bf16.mxu1 %v1417_v17  ;;  %v1448_v25 = vld [vmem:[#allocation7 + $0xb8] sm:$0xff]   ;;  %v1168_v52 = vld [vmem:[%s2021_s4] ss:$0 sm:$0xff] }
  0x7c   : > { %1221 = vmatpush3.bf16.msra.mxu0 %v1415_v15  ;;  %v1438_v15 = vld [vmem:[#allocation7 + $0x60] sm:$0xff]  }
  0x7d   : > { %1222 = vmatprep.subr.bf16.mxu0 %v1416_v19  ;;  %v1442_v19 = vld [vmem:[#allocation7 + $0xa8] sm:$0xff]  }
  0x7e   : > { %1297 = vmatpush3.bf16.msra.mxu1 %v1417_v17  ;;  %v1440_v17 = vld [vmem:[#allocation7 + $0x20] sm:$0xff]  }
  0x7f   : > { %1298 = vmatprep.subr.bf16.mxu1 %v1420_v24 }
  0x80   : > { %1223 = vmatpush3.bf16.msra.mxu0 %v1418_v22  ;;  %v1445_v22 = vld [vmem:[#allocation7 + $0xb0] sm:$0xff]  }
  0x81   : > { %1224 = vmatprep.subr.bf16.mxu0 %v1419_v26  ;;  %v1449_v26 = vld [vmem:[#allocation7 + $0x38] sm:$0xff]  }
  0x82   : > { %1299 = vmatpush3.bf16.msra.mxu1 %v1420_v24  ;;  %v1447_v24 = vld [vmem:[#allocation7 + $0x78] sm:$0xff]  }
  0x83   : > { %1300 = vmatprep.subr.bf16.mxu1 %v1423_v28 }
  0x84   : > { %1225 = vmatpush3.bf16.msra.mxu0 %v1421_v27 }
  0x85   : > { %1226 = vmatprep.subr.bf16.mxu0 %v1422_v36 }
  0x86   : > { %1301 = vmatpush3.bf16.msra.mxu1 %v1423_v28 }
  0x87   : > { %1302 = vmatprep.subr.bf16.mxu1 %v1425_v50 }
  0x88   : > { %1227 = vmatpush3.bf16.msra.mxu0 %v1424_v41 }
  0x89   : > { %1250 = vmatprep.subr.bf16.mxu0 %v1426_v54 }
  0x8a   : > { %1303 = vmatpush3.bf16.msra.mxu1 %v1425_v50 }
  0x8b   : > { %1158 = vmatmul.mubr.msk.bf16.vlgmr.msra.gmra.mrb[0].mxu0 %vm1879_vm6, %v1157_v57  ;;  %1308 = vmatprep.subr.bf16.mxu1 %v1427_v60 }
  0x8c   : > { %611 = vmatprep.mubr.bf16.mxu0 %v369_v61  ;;  %1251 = vmatpush3.bf16.msra.mxu0 %v1428_v0 }
  0x8d   : > { %1305 = vmatmul.mubr.msk.bf16.vlgmr.msra.gmra.mrb[0].mxu1 %vm1903_vm9, %v1166_v2  ;;  %1252 = vmatprep.subr.bf16.mxu0 %v1429_v1 }
  0x8e   : > { %1309 = vmatpush3.bf16.msra.mxu1 %v1427_v60 }
  0x8f   : > { %1310 = vmatprep.subr.bf16.mxu1 %v1430_v3 }
  0x90   : > { %1253 = vmatpush3.bf16.msra.mxu0 %v1431_v4 }
  0x91   : > { %1254 = vmatprep.subr.bf16.mxu0 %v1432_v8 }
  0x92   : > { %1311 = vmatpush3.bf16.msra.mxu1 %v1430_v3 }
  0x93   : > { %1161 = vmatmul.mubr.msk.bf16.gmra.mrb[4].mxu0 %vm1915_vm10, %v1160_v7  ;;  %1312 = vmatprep.subr.bf16.mxu1 %v1433_v9 }
  0x94   : > { %1255 = vmatpush3.bf16.msra.mxu0 %v1434_v10 }
  0x95   : > { %1256 = vmatprep.subr.bf16.mxu0 %v1435_v11 }
  0x96   : > { %1313 = vmatpush3.bf16.msra.mxu1 %v1433_v9 }
  0x97   : > { %1314 = vmatprep.subr.bf16.mxu1 %v1436_v13 }
  0x98   : > { %1257 = vmatpush3.bf16.msra.mxu0 %v1437_v14 }
  0x99   : > { %1258 = vmatprep.subr.bf16.mxu0 %v1438_v15 }
  0x9a   : > { %1315 = vmatpush3.bf16.msra.mxu1 %v1436_v13 }
  0x9b   : > { %1316 = vmatprep.subr.bf16.mxu1 %v1439_v16 }
  0x9c   : > { %1259 = vmatpush3.bf16.msra.mxu0 %v1440_v17 }
  0x9d   : > { %1260 = vmatprep.subr.bf16.mxu0 %v1441_v18 }
  0x9e   : > { %1317 = vmatpush3.bf16.msra.mxu1 %v1439_v16 }
  0x9f   : > { %1318 = vmatprep.subr.bf16.mxu1 %v1442_v19 }
  0xa0   : > { %1261 = vmatpush3.bf16.msra.mxu0 %v1443_v20 }
  0xa1   : > { %1262 = vmatprep.subr.bf16.mxu0 %v1444_v21 }
  0xa2   : > { %1319 = vmatpush3.bf16.msra.mxu1 %v1442_v19 }
  0xa3   : > { %1320 = vmatprep.subr.bf16.mxu1 %v1445_v22 }
  0xa4   : > { %1263 = vmatpush3.bf16.msra.mxu0 %v1446_v23 }
  0xa5   : > { %1264 = vmatprep.subr.bf16.mxu0 %v1447_v24 }
  0xa6   : > { %1321 = vmatpush3.bf16.msra.mxu1 %v1445_v22 }
  0xa7   : > { %1322 = vmatprep.subr.bf16.mxu1 %v1448_v25 }
  0xa8   : > { %1265 = vmatpush3.bf16.msra.mxu0 %v1449_v26 }
  0xaa   : > { %1323 = vmatpush3.bf16.msra.mxu1 %v1448_v25 }
 0x15e   : > { %v1228_v27 = vpop.f32.mrb[0].mxu0 }
 0x15f   : > { %v1229_v28 = vpop.f32.mrb[1].mxu0 }
 0x160   : > { %v1230_v33 = vadd.f32 %v1229_v28, %v1228_v27  ;;  %v1231_v34 = vpop.f32.mrb[2].mxu0  ;;  %v1306_v36 = vpop.f32.mrb[0].mxu1 }
 0x161   : > { %v1232_v35 = vpop.f32.mrb[3].mxu0  ;;  %v654_v39 = vpop.f32.mrb[1].mxu1 }
 0x162   : > { %v1233_v37 = vadd.f32 %v1232_v35, %v1231_v34  ;;  %v606_v38 = vadd.f32 %v1230_v33, %v1131_v29  ;;  %v1307_v40 = vpop.f32.mrb[2].mxu1 }
 0x163   : > { %v657_v44 = vpop.f32.mrb[3].mxu1 }
 0x164   : > { %v655_v41 = vadd.f32 %v654_v39, %v606_v38  ;;  %v609_v43 = vadd.f32 %v1233_v37, %v1131_v29 }
 0x166   : > { %v669_v46 = vmax.f32 %v655_v41, 0.0  ;;  %v658_v47 = vadd.f32 %v657_v44, %v609_v43  ;;  %v1234_v48 = vpop.f32.mrb[4].mxu0 }
 0x167   : > { %v1235_v49 = vpop.f32.mrb[5].mxu0 }
 0x168   : > { %v670_v50 = vmax.f32 %v658_v47, 0.0  ;;  %v1236_v51 = vadd.f32 %v1235_v49, %v1234_v48  ;;  %v1237_v53 = vpop.f32.mrb[6].mxu0  ;;  %v673_v54 = vrot.slane %v669_v46, 7  ;;  %v685_v55 = vrot.slane %v669_v46, 1 }
 0x169   : > { %v1238_v57 = vpop.f32.mrb[7].mxu0 }
 0x16a   : > { %v674_v58 = vrot.slane %v670_v50, 7  ;;  %v686_v59 = vrot.slane %v670_v50, 1  ;;  %v614_v60 = vadd.f32 %v1236_v51, %v1131_v29  ;;  %v1239_v61 = vadd.f32 %v1238_v57, %v1237_v53 }
 0x16b   : > { %v699_v62 = vpack.c.bf16 %v670_v50, %v669_v46 }
 0x16c   : > { %v679_v0 = vsel %vm344_vm0, %v673_v54, %v674_v58  ;;  %v663_v1 = vadd.f32 %v1306_v36, %v614_v60  ;;  %v617_v2 = vadd.f32 %v1239_v61, %v1131_v29  ;;  %v691_v3 = vsel %vm357_vm1, %v685_v55, %v686_v59 }
 0x16d   : > { %934 = vmatprep.mubr.bf16.mxu0 %v699_v62 }
 0x16e   : > { %v671_v4 = vmax.f32 %v663_v1, 0.0  ;;  %v666_v5 = vadd.f32 %v1307_v40, %v617_v2 }
 0x170   : > { %v675_v6 = vrot.slane %v671_v4, 7  ;;  %v687_v7 = vrot.slane %v671_v4, 1  ;;  %v672_v8 = vmax.f32 %v666_v5, 0.0 }
 0x172   : > { %v676_v9 = vrot.slane %v672_v8, 7  ;;  %v688_v10 = vrot.slane %v672_v8, 1  ;;  %v690_v11 = vsel %vm357_vm1, %v686_v59, %v687_v7  ;;  %v700_v13 = vpack.c.bf16 %v672_v8, %v671_v4 }
 0x173   : > { %v1200_v14 = vpack.c.bf16 %v690_v11, %v691_v3  ;;  %v678_v15 = vsel %vm344_vm0, %v674_v58, %v675_v6 }
 0x174   : > { %v680_v16 = vsel %vm344_vm0, %v676_v9, %v673_v54  ;;  %v689_v17 = vsel %vm357_vm1, %v687_v7, %v688_v10  ;;  %v692_v18 = vsel %vm357_vm1, %v688_v10, %v685_v55  ;;  %v677_v19 = vsel %vm344_vm0, %v675_v6, %v676_v9 }
 0x175   : > { %v1194_v20 = vpack.c.bf16 %v679_v0, %v680_v16  ;;  %1324 = vmatprep.mubr.msk.bf16.mxu1 %vm1894_vm7, %v1200_v14  ;;  %v1203_v21 = vpack.c.bf16 %v692_v18, %v689_v17  ;;  %v1197_v22 = vpack.c.bf16 %v677_v19, %v678_v15 }
 0x177   : > { %1195 = vmatmul.mubr.msk.bf16.vlgmr.msra.gmra.mrb[8].mxu0 %vm1879_vm6, %v1194_v20  ;;  %1325 = vmatmul.mubr.msk.bf16.vlgmr.msra.gmra.mrb[4].mxu1 %vm1903_vm9, %v1203_v21 }
 0x178   : > { %942 = vmatprep.mubr.bf16.mxu0 %v700_v13 }
 0x17f   : > { %1198 = vmatmul.mubr.msk.bf16.gmra.mrb[12].mxu0 %vm1915_vm10, %v1197_v22 }
 0x24a   : > { %v1266_v23 = vpop.f32.mrb[8].mxu0  ;;  %v1326_v24 = vpop.f32.mrb[4].mxu1 }
 0x24b   : > { %v1267_v12 = vpop.f32.mrb[9].mxu0  ;;  %v985_v25 = vpop.f32.mrb[5].mxu1 }
 0x24c   : > { %v1268_v26 = vadd.f32 %v1267_v12, %v1266_v23  ;;  %v1269_v27 = vpop.f32.mrb[10].mxu0  ;;  %v1327_v28 = vpop.f32.mrb[6].mxu1 }
 0x24d   : > { %v1270_v45 = vpop.f32.mrb[11].mxu0  ;;  %v988_v29 = vpop.f32.mrb[7].mxu1 }
 0x24e   : > { %v937_v56 = vadd.f32 %v1268_v26, %v1168_v52  ;;  %v1271_v33 = vadd.f32 %v1270_v45, %v1269_v27 }
 0x250   : > { %v986_v34 = vadd.f32 %v985_v25, %v937_v56  ;;  %v940_v35 = vadd.f32 %v1271_v33, %v1168_v52 }
 0x252   : > { %v1000_v63 = vadd.f32 %v986_v34, %v1850_v30  ;;  %v989_v36 = vadd.f32 %v988_v29, %v940_v35  ;;  %v1272_v37 = vpop.f32.mrb[12].mxu0 }
 0x253   : > { %v1273_v38 = vpop.f32.mrb[13].mxu0 }
 0x254   : > { %v1004_v39 = vmax.f32 %v1000_v63, 0.0  ;;  %v1001_v40 = vadd.f32 %v989_v36, %v1853_v31  ;;  %v1274_v41 = vadd.f32 %v1273_v38, %v1272_v37  ;;  %v1275_v43 = vpop.f32.mrb[14].mxu0 }
 0x255   : > { %v1276_v44 = vpop.f32.mrb[15].mxu0 }
 0x256   : > { %1008 = vst [vmem:[%s271_s11] sm:$0xff] %v1004_v39  ;;  %v1005_v46 = vmax.f32 %v1001_v40, 0.0  ;;  %v945_v47 = vadd.f32 %v1274_v41, %v1168_v52  ;;  %v1277_v48 = vadd.f32 %v1276_v44, %v1275_v43 }
 0x258   : > { %1009 = vst [vmem:[%s271_s11 + $0x8] sm:$0xff] %v1005_v46  ;;  %v994_v49 = vadd.f32 %v1326_v24, %v945_v47  ;;  %v948_v30 = vadd.f32 %v1277_v48, %v1168_v52 }
 0x25a   : > { %v1002_v50 = vadd.f32 %v994_v49, %v1872_v42  ;;  %v997_v51 = vadd.f32 %v1327_v28, %v948_v30 }
 0x25c   : > { %v1006_v31 = vmax.f32 %v1002_v50, 0.0  ;;  %v1003_v53 = vadd.f32 %v997_v51, %v1856_v32 }
 0x25e   : > { %1010 = vst [vmem:[%s271_s11 + $0x10] sm:$0xff] %v1006_v31  ;;  %v1007_v54 = vmax.f32 %v1003_v53, 0.0 }
 0x260   : > { %1011 = vst [vmem:[%s271_s11 + $0x18] sm:$0xff] %v1007_v54 }
 0x261   : > { %1549 = shalt.err (!%p1546_p2)
}
 0x262   : > { %s1550_s6 = scalar_lea.hbm %s1973_s9, 512  ;;  %s1554_s8 = scalar_lea.hbm %s2022_s5, 1024 }
 0x263   : > { %p1551_p13 = scmp.ne.s32.totalorder %s1973_s9, %s1550_s6  ;;  %p1555_p4 = scmp.lt.u32.totalorder %s1973_s9, %s2022_s5 }
 0x264   : > { %p1556_p5 = scmp.lt.u32.totalorder %s1554_s8, %s1550_s6  ;;  %p1558_p11 = scmp.lt.u32.totalorder %s1550_s6, %s1973_s9 }
 0x265   : > { %p1552_p6 = pnand %p1551_p13, %p2050_p0 }
 0x266   : > { %p1557_p8 = por %p1556_p5, %p1555_p4 }
 0x267   : > { %p1553_p10 = pneg %p1552_p6 }
 0x268   : > { %p1559_p1 = por %p1558_p11, %p1557_p8 }
 0x26a   : > { %p1560_p3 = pnand %p1559_p1, %p1553_p10 }
 0x26c   : > { %1563 = shalt.err (!%p1560_p3)
}
 0x26d   : > { %s1617_s30 = smov 128   ;;  %s1618_s15 = smov 8  }
 0x26e   : > { %1338 = dma.vmem_to_hbm [thread:$0]  (%p2050_p0), %s1967_s28, 512, %s1973_s9, %s1013_s12, %s1617_s30, %s1617_s30, %s1618_s15  }
 0x26f PF: > { %s1041_s16 = sand.u32 1, %s1594_s18   ;;  %p2051_p7 = scmp.ne.s32.totalorder %s2027_s25, 0 }
 0x270   : > { %p2052_p9 = scmp.ge.s32.totalorder %s1606_s21, 2  ;;  %s1042_s13 = scalar_lea.sflag [#allocation4], %s1041_s16 }
 0x272   : > { %p1352_p12 = pnand %p2052_p9, %p2051_p7 }
 0x274   : > { %1589 = dma.done.wait (!%p1352_p12), %s1042_s13, 512  }
 0x275   : > { %1591 = vsyncadd (!%p1352_p12), %s1042_s13, 4294966784  ;;  %p19_p2 = scmp.ge.s32.totalorder %s1759_s14, 4   ;;  %s2053_s18 = smov %s1598_s19 }
 0x276   : > { %s2054_s19 = smov %s1602_s20  ;;  %s2055_s20 = smov %s1775_s27 }
 0x277   : > { %s2056_s21 = smov %s1759_s14  ;;  %21 = sbr.rel (!%p19_p2) target bundleno = 6 (0x6), region = 93 }
 0x27e   :  { %1047 = vsyncpa [#allocation3], 1 }
 0x27f   :  { %1049 = vsyncpa [#allocation3 + $0x1], 1 }
 0x280   :  { %1050 = vsyncpa [#allocation6], 1 }
 0x281   :  { %1051 = vsyncpa [#allocation4], 1 }
 0x282   :  { %1053 = vsyncpa [#allocation4 + $0x1], 1 }

</bundles_post_ra>
